<compile_context>
chip_gen: v7x
topology: tpu7x:2x2x1
jax: 0.10.0
libtpu: 0.0.40
codegen_flags: <defaults>
</compile_context>

<pallas_src>
import functools
import math

import jax
import jax.numpy as jnp
from jax import lax
from jax.experimental import pallas as pl
from jax.experimental.pallas import tpu as pltpu


# ----------------------------- LoG filter (plain JAX glue) ------------------

def log_2d_filter(k: int, sigma: jnp.ndarray) -> jnp.ndarray:
    """JAX port of LoG_2d(k, sigma): returns the (k, k) float32 filter."""
    ax = jnp.round(
        jnp.linspace(-math.floor(k / 2), math.floor(k / 2), k)
    ).astype(jnp.float32)
    y = jnp.broadcast_to(ax[:, None], (k, k))
    x = jnp.broadcast_to(ax[None, :], (k, k))
    x2 = x * x
    y2 = y * y
    s = sigma.reshape(())              # sigma is a shape-(1,) parameter
    s2 = s * s
    s4 = s2 * s2
    hg = jnp.exp(-(x2 + y2) / (2.0 * s2))
    kernel_t = hg * (x2 + y2 - 2.0 * s2) / (s4 * jnp.sum(hg))
    kernel = kernel_t - jnp.sum(kernel_t) / float(k * k)
    return kernel.astype(jnp.float32)


# ----------------------------- Pallas kernel --------------------------------

def _stencil_and_store(kflat_ref, s, out_ref, *, ksize, padding, h, w,
                       h_out, w_out, n_acc):
    """Apply the k x k LoG stencil to the channel-sum plane `s`, store once.

    `s` is a (bt, H, W) f32 VALUE; the zero halo is built as a value with
    concatenation (no scratch store/reload). One dense store covers the
    whole output block.
    """
    bt = s.shape[0]
    if padding > 0:
        zrow = jnp.zeros((bt, padding, w), jnp.float32)
        s = jnp.concatenate([zrow, s, zrow], axis=1)           # (bt, Hp, W)
        zcol = jnp.zeros((bt, h + 2 * padding, padding), jnp.float32)
        s = jnp.concatenate([zcol, s, zcol], axis=2)           # (bt, Hp, Wp)

    # Hoist all taps out of the unrolled loop: k*k sld + splats in the prologue.
    taps = [kflat_ref[t] for t in range(ksize * ksize)]

    # k*k shifted-window accumulation, all in f32. Independent partial
    # accumulators break the serial mul+add chain while staying vreg-resident.
    accs = [jnp.zeros((bt, h_out, w_out), jnp.float32) for _ in range(n_acc)]
    t = 0
    for dy in range(ksize):
        for dx in range(ksize):
            win = s[:, dy:dy + h_out, dx:dx + w_out]
            accs[t % n_acc] = accs[t % n_acc] + win * taps[t]
            t += 1
    acc = accs[0]
    for extra in accs[1:]:
        acc = acc + extra

    # Single dense store of the whole block (no per-row masked-store loop).
    out_ref[...] = acc.astype(out_ref.dtype)
    # TODO(synk): for W < 128, flatten the padded plane to (bt, Hp*Wp) and use
    # pltpu.roll by dy*Wp+dx so every VPU op runs with >=128 useful lanes.
    # TODO(synk): for kernel_size >= 5, use the separable LoG decomposition as
    # banded-Toeplitz matmuls (row/col passes) on the MXU.


def _log_conv_kernel(kflat_ref, x_ref, out_ref, *scratch, ksize, padding,
                     h, w, h_out, w_out, n_acc, multi_cin):
    # kflat_ref: (k*k,) f32 LoG taps in SMEM (scalar reads).
    # x_ref    : (bt, Ct, H, W) UNPADDED input block in VMEM.
    # out_ref  : (bt, Ho, Wo) output block (same block across all C_in steps).
    # scratch  : [(bt, H, W) f32 channel-sum accumulator] iff multi_cin.
    part = jnp.sum(x_ref[...].astype(jnp.float32), axis=1)     # (bt, H, W)

    if not multi_cin:
        # Whole channel sum in one step: no accumulator round trip at all.
        _stencil_and_store(kflat_ref, part, out_ref, ksize=ksize,
                           padding=padding, h=h, w=w,
                           h_out=h_out, w_out=w_out, n_acc=n_acc)
        return

    s_acc = scratch[0]
    c = pl.program_id(1)

    @pl.when(c == 0)
    def _():
        s_acc[...] = jnp.zeros_like(s_acc)

    s_acc[...] += part

    @pl.when(c == pl.num_programs(1) - 1)
    def _():
        _stencil_and_store(kflat_ref, s_acc[...], out_ref, ksize=ksize,
                           padding=padding, h=h, w=w,
                           h_out=h_out, w_out=w_out, n_acc=n_acc)


def log2d_forward(x, sigma, *, out_channels, kernel_size, padding=0,
                  batch_tile=None, cin_tile=None):
    """Forward pass of LoG2d.  x: (N, C_in, H, W) float32, NCHW.

    stride/dilation are intentionally ignored, matching the PyTorch forward
    which never forwards them to F.conv2d.
    """
    n, c_in, h, w = x.shape
    k = kernel_size
    h_out = h + 2 * padding - k + 1
    w_out = w + 2 * padding - k + 1

    # Tiny (k*k,) LoG taps from sigma, flattened for SMEM scalar reads.
    kflat = log_2d_filter(k, sigma).reshape(-1)

    # Batch tile: keep >= 2 grid steps on the 'parallel' batch axis whenever
    # N >= 2 so both v7x TensorCores get work; cap at 8.
    if batch_tile is None:
        bt = max(1, min(8, -(-n // 2)))
    else:
        bt = batch_tile
    bt = min(bt, n)

    # C_in tile: keep each (bt, ct, H, W) f32 input block under ~6 MiB so the
    # double-buffered pipeline (2x in + 2x out + scratch) stays well inside
    # v7x's 64 MiB physical VMEM (comfortable on 128 MiB v5e/v6e). The tile
    # must divide C_in exactly: unlike ragged batch rows, out-of-range
    # channel rows would corrupt the channel-sum reduction.
    if cin_tile is None:
        x_block_budget = 6 * 1024 * 1024
        max_ct = max(1, x_block_budget // (bt * h * w * 4))
        if c_in <= max_ct:
            ct = c_in
        else:
            ct = max(d for d in range(1, max_ct + 1) if c_in % d == 0)
    else:
        ct = cin_tile
    assert c_in % ct == 0, "cin_tile must divide C_in"
    n_cin = c_in // ct
    multi_cin = n_cin > 1

    # Partial accumulators only while they stay vreg-resident.
    acc_bytes = bt * h_out * w_out * 4
    n_acc = 3 if 3 * acc_bytes <= 96 * 1024 else 1
    n_acc = min(n_acc, k * k)

    grid = (pl.cdiv(n, bt), n_cin)

    kernel_fn = functools.partial(
        _log_conv_kernel,
        ksize=k, padding=padding, h=h, w=w, h_out=h_out, w_out=w_out,
        n_acc=n_acc, multi_cin=multi_cin,
    )

    scratch_shapes = (
        [pltpu.VMEM((bt, h, w), jnp.float32)] if multi_cin else []
    )

    # TODO(synk): for very large H, additionally tile H into strips with a
    # (k-1)-row halo so the spatial plane itself never exceeds the VMEM budget.
    out_plane = pl.pallas_call(
        kernel_fn,
        out_shape=jax.ShapeDtypeStruct((n, h_out, w_out), x.dtype),
        grid=grid,
        in_specs=[
            pl.BlockSpec(memory_space=pltpu.MemorySpace.SMEM),          # taps
            pl.BlockSpec((bt, ct, h, w), lambda b, c: (b, c, 0, 0)),    # x
        ],
        out_specs=pl.BlockSpec((bt, h_out, w_out), lambda b, c: (b, 0, 0)),
        scratch_shapes=scratch_shapes,
        compiler_params=pltpu.CompilerParams(
            dimension_semantics=("parallel", "arbitrary"),
            vmem_limit_bytes=32 * 1024 * 1024,
        ),
    )(kflat, x)

    # One spatial plane per sample; the C_out replication is a lazy broadcast.
    # Keep it inside the same jit as its consumer so XLA fuses it and the HBM
    # writeback stays 1/C_out of a full conv output.
    out = out_plane.reshape(n, 1, h_out, w_out)
    return jnp.broadcast_to(out, (n, out_channels, h_out, w_out))


# ----------------------------- pure-JAX reference ---------------------------

def log2d_reference(x, sigma, *, out_channels, kernel_size, padding=0):
    c_in = x.shape[1]
    log_k = log_2d_filter(kernel_size, sigma)
    # kernel.repeat(out, in, 1).view(out, in, k, k) == tile to every pair
    full_k = jnp.broadcast_to(
        log_k[None, None], (out_channels, c_in, kernel_size, kernel_size)
    )
    return lax.conv_general_dilated(
        x, full_k,
        window_strides=(1, 1),
        padding=[(padding, padding), (padding, padding)],
        dimension_numbers=("NCHW", "OIHW", "NCHW"),
    )


# ----------------------------- main ------------------------------------------

if __name__ == "__main__":
    key = jax.random.PRNGKey(0)
    k_x, k_sigma = jax.random.split(key)

    N, C_IN, C_OUT, H, W = 2, 4, 4, 16, 16
    KSIZE, PAD = 3, 1

    x = jax.random.normal(k_x, (N, C_IN, H, W), dtype=jnp.float32)
    # sigma parameter: shape (1,), init uniform(0.0001, 0.9999) like init_weights()
    sigma = jax.random.uniform(k_sigma, (1,), jnp.float32, 0.0001, 0.9999)

    fwd = jax.jit(functools.partial(
        log2d_forward, out_channels=C_OUT, kernel_size=KSIZE, padding=PAD))
    out = jax.block_until_ready(fwd(x, sigma))

    ref = jax.block_until_ready(
        log2d_reference(x, sigma, out_channels=C_OUT,
                        kernel_size=KSIZE, padding=PAD)
    )

    assert out.shape == (N, C_OUT, H + 2 * PAD - KSIZE + 1, W + 2 * PAD - KSIZE + 1)
    assert jnp.allclose(out, ref, atol=1e-4, rtol=1e-4), (
        float(jnp.max(jnp.abs(out - ref)))
    )
    print("KERNEL_OK")
</pallas_src>

<mosaic_0001>
module attributes {stable_mosaic.version = 11 : i64} {
  func.func @_log_conv_kernel(%arg0: i32, %arg1: i32, %arg2: memref<9xf32, #tpu.memory_space<smem>>, %arg3: memref<1x4x16x16xf32, #tpu.memory_space<vmem>>, %arg4: memref<1x16x16xf32, #tpu.memory_space<vmem>>) attributes {dimension_semantics = [#tpu.dimension_semantics<parallel>, #tpu.dimension_semantics<arbitrary>], iteration_bounds = array<i64: 2, 1>, scalar_prefetch = 0 : i64, scratch_operands = 0 : i64, tpu.core_type = #tpu.core_type<tc>, window_params = [{transform_indices = @transform_0, window_bounds = array<i64: 9>}, {transform_indices = @transform_1, window_bounds = array<i64: 1, 4, 16, 16>}, {transform_indices = @transform_2, window_bounds = array<i64: 1, 16, 16>}]} {
    %c0 = arith.constant 0 : index
    %c0_0 = arith.constant 0 : index
    %c0_1 = arith.constant 0 : index
    %c0_2 = arith.constant 0 : index
    %0 = vector.load %arg3[%c0, %c0_0, %c0_1, %c0_2] : memref<1x4x16x16xf32, #tpu.memory_space<vmem>>, vector<1x4x16x16xf32>
    %cst = arith.constant dense<0.000000e+00> : vector<1x16x16xf32>
    %1 = vector.multi_reduction <add>, %0, %cst [1] : vector<1x4x16x16xf32> to vector<1x16x16xf32>
    %cst_3 = arith.constant 0.000000e+00 : f32
    %2 = vector.broadcast %cst_3 : f32 to vector<1x1x16xf32>
    %3 = tpu.concatenate %2, %1, %2 in 1 : vector<1x1x16xf32>, vector<1x16x16xf32>, vector<1x1x16xf32> -> vector<1x18x16xf32>
    %cst_4 = arith.constant 0.000000e+00 : f32
    %4 = vector.broadcast %cst_4 : f32 to vector<1x18x1xf32>
    %5 = tpu.concatenate %4, %3, %4 in 2 : vector<1x18x1xf32>, vector<1x18x16xf32>, vector<1x18x1xf32> -> vector<1x18x18xf32>
    %c0_5 = arith.constant 0 : index
    %6 = memref.load %arg2[%c0_5] : memref<9xf32, #tpu.memory_space<smem>>
    %c1 = arith.constant 1 : index
    %7 = memref.load %arg2[%c1] : memref<9xf32, #tpu.memory_space<smem>>
    %c2 = arith.constant 2 : index
    %8 = memref.load %arg2[%c2] : memref<9xf32, #tpu.memory_space<smem>>
    %c3 = arith.constant 3 : index
    %9 = memref.load %arg2[%c3] : memref<9xf32, #tpu.memory_space<smem>>
    %c4 = arith.constant 4 : index
    %10 = memref.load %arg2[%c4] : memref<9xf32, #tpu.memory_space<smem>>
    %c5 = arith.constant 5 : index
    %11 = memref.load %arg2[%c5] : memref<9xf32, #tpu.memory_space<smem>>
    %c6 = arith.constant 6 : index
    %12 = memref.load %arg2[%c6] : memref<9xf32, #tpu.memory_space<smem>>
    %c7 = arith.constant 7 : index
    %13 = memref.load %arg2[%c7] : memref<9xf32, #tpu.memory_space<smem>>
    %c8 = arith.constant 8 : index
    %14 = memref.load %arg2[%c8] : memref<9xf32, #tpu.memory_space<smem>>
    %cst_6 = arith.constant 0.000000e+00 : f32
    %15 = vector.broadcast %cst_6 : f32 to vector<1x16x16xf32>
    %cst_7 = arith.constant 0.000000e+00 : f32
    %16 = vector.broadcast %cst_7 : f32 to vector<1x16x16xf32>
    %cst_8 = arith.constant 0.000000e+00 : f32
    %17 = vector.broadcast %cst_8 : f32 to vector<1x16x16xf32>
    %18 = vector.extract_strided_slice %5 {offsets = [0, 0, 0], sizes = [1, 16, 16], strides = [1, 1, 1]} : vector<1x18x18xf32> to vector<1x16x16xf32>
    %19 = vector.broadcast %6 : f32 to vector<1x16x16xf32>
    %20 = arith.mulf %18, %19 : vector<1x16x16xf32>
    %21 = arith.addf %15, %20 : vector<1x16x16xf32>
    %22 = vector.extract_strided_slice %5 {offsets = [0, 0, 1], sizes = [1, 16, 16], strides = [1, 1, 1]} : vector<1x18x18xf32> to vector<1x16x16xf32>
    %23 = vector.broadcast %7 : f32 to vector<1x16x16xf32>
    %24 = arith.mulf %22, %23 : vector<1x16x16xf32>
    %25 = arith.addf %16, %24 : vector<1x16x16xf32>
    %26 = vector.extract_strided_slice %5 {offsets = [0, 0, 2], sizes = [1, 16, 16], strides = [1, 1, 1]} : vector<1x18x18xf32> to vector<1x16x16xf32>
    %27 = vector.broadcast %8 : f32 to vector<1x16x16xf32>
    %28 = arith.mulf %26, %27 : vector<1x16x16xf32>
    %29 = arith.addf %17, %28 : vector<1x16x16xf32>
    %30 = vector.extract_strided_slice %5 {offsets = [0, 1, 0], sizes = [1, 16, 16], strides = [1, 1, 1]} : vector<1x18x18xf32> to vector<1x16x16xf32>
    %31 = vector.broadcast %9 : f32 to vector<1x16x16xf32>
    %32 = arith.mulf %30, %31 : vector<1x16x16xf32>
    %33 = arith.addf %21, %32 : vector<1x16x16xf32>
    %34 = vector.extract_strided_slice %5 {offsets = [0, 1, 1], sizes = [1, 16, 16], strides = [1, 1, 1]} : vector<1x18x18xf32> to vector<1x16x16xf32>
    %35 = vector.broadcast %10 : f32 to vector<1x16x16xf32>
    %36 = arith.mulf %34, %35 : vector<1x16x16xf32>
    %37 = arith.addf %25, %36 : vector<1x16x16xf32>
    %38 = vector.extract_strided_slice %5 {offsets = [0, 1, 2], sizes = [1, 16, 16], strides = [1, 1, 1]} : vector<1x18x18xf32> to vector<1x16x16xf32>
    %39 = vector.broadcast %11 : f32 to vector<1x16x16xf32>
    %40 = arith.mulf %38, %39 : vector<1x16x16xf32>
    %41 = arith.addf %29, %40 : vector<1x16x16xf32>
    %42 = vector.extract_strided_slice %5 {offsets = [0, 2, 0], sizes = [1, 16, 16], strides = [1, 1, 1]} : vector<1x18x18xf32> to vector<1x16x16xf32>
    %43 = vector.broadcast %12 : f32 to vector<1x16x16xf32>
    %44 = arith.mulf %42, %43 : vector<1x16x16xf32>
    %45 = arith.addf %33, %44 : vector<1x16x16xf32>
    %46 = vector.extract_strided_slice %5 {offsets = [0, 2, 1], sizes = [1, 16, 16], strides = [1, 1, 1]} : vector<1x18x18xf32> to vector<1x16x16xf32>
    %47 = vector.broadcast %13 : f32 to vector<1x16x16xf32>
    %48 = arith.mulf %46, %47 : vector<1x16x16xf32>
    %49 = arith.addf %37, %48 : vector<1x16x16xf32>
    %50 = vector.extract_strided_slice %5 {offsets = [0, 2, 2], sizes = [1, 16, 16], strides = [1, 1, 1]} : vector<1x18x18xf32> to vector<1x16x16xf32>
    %51 = vector.broadcast %14 : f32 to vector<1x16x16xf32>
    %52 = arith.mulf %50, %51 : vector<1x16x16xf32>
    %53 = arith.addf %41, %52 : vector<1x16x16xf32>
    %54 = arith.addf %45, %49 : vector<1x16x16xf32>
    %55 = arith.addf %54, %53 : vector<1x16x16xf32>
    %c0_9 = arith.constant 0 : index
    %c0_10 = arith.constant 0 : index
    %c0_11 = arith.constant 0 : index
    %56 = vector.load %arg4[%c0_9, %c0_10, %c0_11] : memref<1x16x16xf32, #tpu.memory_space<vmem>>, vector<1x16x16xf32>
    tpu.vector_store %arg4[%c0_9, %c0_10, %c0_11], %55 {strides = array<i32>} : memref<1x16x16xf32, #tpu.memory_space<vmem>>, vector<1x16x16xf32>,
    return
  }
  func.func @transform_0(%arg0: i32, %arg1: i32) -> i32 {
    %c0_i32 = arith.constant 0 : i32
    %c0_i32_0 = arith.constant 0 : i32
    return %c0_i32 : i32
  }
  func.func @transform_1(%arg0: i32, %arg1: i32) -> (i32, i32, i32, i32) {
    %c0_i32 = arith.constant 0 : i32
    %c0_i32_0 = arith.constant 0 : i32
    %c0_i32_1 = arith.constant 0 : i32
    return %arg0, %arg1, %c0_i32, %c0_i32_0 : i32, i32, i32, i32
  }
  func.func @transform_2(%arg0: i32, %arg1: i32) -> (i32, i32, i32) {
    %c0_i32 = arith.constant 0 : i32
    %c0_i32_0 = arith.constant 0 : i32
    %c0_i32_1 = arith.constant 0 : i32
    return %arg0, %c0_i32, %c0_i32_0 : i32, i32, i32
  }
}

</mosaic_0001>

<bundles_post_ra>
// kernel: log2d_forward.1
= control target key start
LH: loop header
LB: loop body
LE: loop exit
PB: predicated region body
PF: predicated region fallthrough
CT: control target
= control target key end

     0   :  { %7 = vsyncpa [#allocation4], 0  ;;  %s888_s0 = inlined_call_operand.vmem [shape: f32[9], index: 0, kind: input, shape index: {}]   ;;  %s889_s1 = inlined_call_operand.hbm [shape: f32[2,4,16,16], index: 1, kind: input, shape index: {}]   ;;  %s890_s2 = inlined_call_operand.vmem [shape: f32[2,16,16], index: 2, kind: output, shape index: {}]  }
   0x1   :  { %8 = vsyncpa [#allocation3], 0 }
   0x2   :  { %10 = vsyncpa [#allocation3 + $0x1], 0  ;;  %s698_s9 = smov 0   ;;  %s700_s10 = smov 0  }
   0x3   :  { %s702_s11 = smov 0   ;;  %s704_s12 = smov 0  }
   0x4   :  { %s706_s13 = smov 0   ;;  %s708_s14 = smov 0  }
   0x5 LB: > { %s479_s15 = sadd.s32 4294967295, %s674_s14   ;;  %s58_s16 = sadd.s32 1, %s662_s11  ;;  %s674_s14 = sphi %s708_s14, %s16_s14   ;;  %s670_s13 = sphi %s706_s13, %s907_s13   ;;  %s666_s12 = sphi %s704_s12, %s906_s12   ;;  %s662_s11 = sphi %s702_s11, %s905_s11   ;;  %s658_s10 = sphi %s700_s10, %s904_s10   ;;  %s654_s9 = sphi %s698_s9, %s903_s9  }
   0x6   : > { %p65_p0 = scmp.ne.s32.totalorder %s662_s11, %s658_s10  ;;  %p66_p1 = scmp.eq.s32.totalorder %s674_s14, 0 }
   0x7   : > { %p71_p2 = scmp.ne.s32.totalorder %s658_s10, %s654_s9  ;;  %p732_p3 = scmp.eq.s32.totalorder %s479_s15, 0 }
   0x8   : > { %p67_p4 = por %p66_p1, %p65_p0  ;;  %p481_p5 = scmp.ge.s32.totalorder %s674_s14, 1 }
   0x9   : > { %s895_s17 = scalar_select %p732_p3, 1, 0 }
   0xa   : > { %p739_p6 = por %p732_p3, %p71_p2  ;;  %p108_p7 = scmp.lt.s32.totalorder %s674_s14, 3 }
   0xb   : > { %s121_s21 = sshll.u32 %s888_s0, 4  ;;  %p519_p10 = scmp.lt.s32.totalorder %s674_s14, 2  ;;  %s122_s21 = int_to_ptr.vmem [resolvable:$true] %s121_s21 }
   0xc   : > { %s896_s18 = scalar_select %p739_p6, 1, 0 }
   0xd   : > { %p747_p8 = pnand %p481_p5, %p108_p7  ;;  %s132_s23 = sand.u32 1, %s662_s11  }
   0xe   : > { %p757_p12 = pnand %p519_p10, %p67_p4  ;;  %s575_s25 = scalar_lea.vmem %s122_s21, 16 }
   0xf   : > { %s897_s22 = scalar_select %p747_p8, 1, 0 }
  0x10   : > { %p510_p9 = pneg %p747_p8  ;;  %p576_p13 = scmp.ne.s32.totalorder %s122_s21, %s575_s25 }
  0x11   : > { %p583_p5 = scmp.lt.s32.totalorder %s122_s21, %s122_s21  ;;  %p584_p7 = scmp.lt.s32.totalorder %s575_s25, %s575_s25 }
  0x12   : > { %p511_p11 = pnand %p510_p9, %p732_p3 }
  0x13   : > { %p585_p6 = por %p584_p7, %p583_p5 }
  0x14   : > { %p577_p0 = pneg %p511_p11 }
  0x16   : > { %p578_p1 = pnand %p577_p0, %p576_p13 }
  0x18   : > { %p579_p2 = pneg %p578_p1 }
  0x1a   : > { %p586_p8 = pnand %p585_p6, %p579_p2 }
  0x1c   : > { %589 = shalt.err (!%p586_p8)
}
  0x1d   : > { %s676_s26 = smov [#allocation2]   ;;  %s28_s27 = sadd.s32 1, %s670_s13 }
  0x1e   : > { %513 = dma.vmem_to_smem (!%p511_p11), %s122_s21, 16, %s676_s26, [#allocation4]  }
  0x1f   : > { %s484_s28 = sshll.u32 %s132_s23, 6  ;;  %p30_p4 = scmp.ge.s32.totalorder %s28_s27, 2 }
  0x20   : > { %s502_s29 = sshll.u32 %s670_s13, 10  ;;  %s136_s30 = scalar_lea.vmem [#allocation5], %s484_s28 }
  0x21   : > { %s146_s3 = sshll.u32 %s136_s30, 4  ;;  %s909_s27 = smov (%p30_p4, %s28_s27), 0  ;;  %s770_s3 = int_to_ptr.vmem [resolvable:$true] %s146_s3 }
  0x22   : > { %s768_s6 = scalar_lea.hbm %s889_s1, %s502_s29  ;;  %s53_s7 = ssub.s32 %s670_s13, %s909_s27 }
  0x23   : > { %p774_p6 = scmp.eq.s32.totalorder %s53_s7, 0  ;;  %s778_s9 = scalar_lea.sflag [#allocation3], %s132_s23 }
  0x24   : > { %s590_s15 = scalar_lea.hbm %s768_s6, 1024  ;;  %p592_p9 = pneg %p757_p12 }
  0x25   : > { %p591_p8 = scmp.ne.s32.totalorder %s768_s6, %s590_s15  ;;  %s595_s21 = scalar_lea.hbm %s889_s1, 2048 }
  0x26   : > { %p596_p13 = scmp.lt.u32.totalorder %s768_s6, %s889_s1  ;;  %p597_p0 = scmp.lt.u32.totalorder %s595_s21, %s590_s15 }
  0x27   : > { %p593_p10 = pnand %p592_p9, %p591_p8  ;;  %p599_p2 = scmp.lt.u32.totalorder %s590_s15, %s768_s6 }
  0x28   : > { %p598_p1 = por %p597_p0, %p596_p13 }
  0x29   : > { %p594_p11 = pneg %p593_p10 }
  0x2a   : > { %p600_p5 = por %p599_p2, %p598_p1 }
  0x2c   : > { %p601_p7 = pnand %p600_p5, %p594_p11 }
  0x2e   : > { %604 = shalt.err (!%p601_p7)
}
  0x2f   : > { %s605_s23 = scalar_lea.vmem %s770_s3, 1024  ;;  %s677_s28 = smov [#allocation5]  }
  0x30   : > { %p606_p4 = scmp.ne.s32.totalorder %s770_s3, %s605_s23  ;;  %s610_s29 = sshll.u32 %s677_s28, 4  ;;  %s611_s29 = int_to_ptr.vmem [resolvable:$false] %s610_s29 }
  0x31   : > { %s612_s30 = scalar_lea.vmem %s611_s29, 2048  ;;  %p613_p3 = scmp.lt.s32.totalorder %s770_s3, %s611_s29 }
  0x32   : > { %p608_p8 = pnand %p606_p4, %p592_p9  ;;  %p614_p13 = scmp.lt.s32.totalorder %s612_s30, %s605_s23 }
  0x34   : > { %p609_p10 = pneg %p608_p8  ;;  %p615_p0 = por %p614_p13, %p613_p3 }
  0x36   : > { %p616_p1 = pnand %p615_p0, %p609_p10 }
  0x38   : > { %619 = shalt.err (!%p616_p1)
}
  0x39   : > { %s678_s4 = smov 128   ;;  %s679_s5 = smov 8  }
  0x3a   : > { %517 = dma.hbm_to_vmem [thread:$0]  (!%p757_p12), %s768_s6, 1024, %s770_s3, %s778_s9, %s678_s4, %s678_s4, %s679_s5  }
  0x3b   : > { %s811_s7 = scalar_select %p774_p6, %s662_s11, %s58_s16  }
  0x3c   : > { %p900_p9 = scmp.ne.s32.totalorder %s897_s22, 0 }
  0x3d   : > { %p901_p3 = scmp.ne.s32.totalorder (!%p900_p9), %s895_s17, 0 }
  0x3e   : > { %158 = sbr.rel (%p900_p9) target bundleno = 339 (0x153), region = 28 }
  0x45   : > { %645 = dma.done.wait (%p901_p3), [#allocation4], 16  }
  0x46   : > { %647 = vsyncadd (%p901_p3), [#allocation4], 4294967280  ;;  %s164_s15 = sand.u32 1, %s658_s10   ;;  %p902_p12 = scmp.ne.s32.totalorder %s896_s18, 0 }
  0x47   : > { %s489_s19 = sshll.u32 %s164_s15, 6  ;;  %s165_s20 = scalar_lea.sflag [#allocation3], %s164_s15 }
  0x48   : > { %s168_s24 = scalar_lea.vmem [#allocation5], %s489_s19 }
  0x49   : > { %649 = dma.done.wait (%p902_p12), %s165_s20, 1024  }
  0x4a   : > { %651 = vsyncadd (%p902_p12), %s165_s20, 4294966272 }
  0x4b   : > { %173 = sfence }
  0x4c   : > { %v196_v0 = vld [vmem:[%s168_s24] sm:$0xff]  ;;  %v198_v1 = vld [vmem:[%s168_s24 + $0x10] sm:$0xff]  ;;  %vm204_vm0 = vcmask 130048   ;;  %v197_v7 = vld [vmem:[%s168_s24 + $0x8] sm:$0xff]  ;;  %vm221_vm1 = vcmask 1040384   ;;  %s680_s16 = smov 1  }
  0x4d   : > { %v200_v2 = vld [vmem:[%s168_s24 + $0x20] sm:$0xff]  ;;  %v202_v3 = vld [vmem:[%s168_s24 + $0x30] sm:$0xff]  ;;  %v205_v4 = vsel %vm204_vm0, %v196_v0, 0.0  ;;  %v206_v5 = vsel %vm204_vm0, %v198_v1, 0.0  ;;  %v199_v8 = vld [vmem:[%s168_s24 + $0x18] sm:$0xff]  ;;  %v212_v12 = vsel %vm204_vm0, %v197_v7, 0.0 }
  0x4e   : > { %v208_v6 = vsel %vm204_vm0, %v200_v2, 0.0  ;;  %v207_v9 = vadd.f32 %v206_v5, %v205_v4  ;;  %v201_v10 = vld [vmem:[%s168_s24 + $0x28] sm:$0xff]  ;;  %v203_v11 = vld [vmem:[%s168_s24 + $0x38] sm:$0xff]  ;;  %v213_v13 = vsel %vm204_vm0, %v199_v8, 0.0  ;;  %v210_v14 = vsel %vm204_vm0, %v202_v3, 0.0  ;;  %s495_s17 = sld [smem:[#allocation2 + $0x4]] }
  0x4f   : > { %v214_v15 = vadd.f32 %v213_v13, %v212_v12  ;;  %v215_v16 = vsel %vm204_vm0, %v201_v10, 0.0  ;;  %v217_v18 = vsel %vm204_vm0, %v203_v11, 0.0  ;;  %s498_s18 = sld [smem:[#allocation2 + $0x7]]  ;;  %s496_s22 = sld [smem:[#allocation2 + $0x5]]  ;;  %vm240_vm2 = vcmask 7168  }
  0x50   : > { %v209_v17 = vadd.f32 %v208_v6, %v207_v9  ;;  %s832_s3 = sld [smem:[#allocation2 + $0x1]]  ;;  %s834_s6 = sld [smem:[#allocation2 + $0x2]]  ;;  %vm244_vm3 = vcmask 138240   ;;  %vm279_vm4 = vcmask 1046528   ;;  %vm328_vm5 = vcmask 1045504  }
  0x51   : > { %v216_v19 = vadd.f32 %v215_v16, %v214_v15  ;;  %s499_s8 = sld [smem:[#allocation2 + $0x8]]  ;;  %s494_s21 = sld [smem:[#allocation2 + $0x3]] }
  0x52   : > { %v211_v20 = vadd.f32 %v210_v14, %v209_v17  ;;  %s836_s9 = sld [smem:[#allocation2]]  ;;  %s497_s25 = sld [smem:[#allocation2 + $0x6]] }
  0x53   : > { %v218_v21 = vadd.f32 %v217_v18, %v216_v19  ;;  %s681_s26 = smov 127   ;;  %s682_s23 = smov 126  }
  0x54   : > { %v222_v22 = vrot.slane %v211_v20, 7  ;;  %v289_v28 = vstv %s495_s17  ;;  %p191_p6 = scmp.lt.s32.totalorder %s666_s12, 1 }
  0x55   : > { %v223_v23 = vrot.slane %v218_v21, 7  ;;  %v338_v29 = vstv %s498_s18  ;;  %v305_v31 = vstv %s496_s22 }
  0x56   : > { %v227_v24 = vsel %vm221_vm1, 0.0, %v222_v22  ;;  %v262_v33 = vstv %s832_s3  ;;  %v267_v36 = vstv %s834_s6  ;;  %s911_s12 = smov (!%p191_p6, %s666_s12), 1 }
  0x57   : > { %231 = vrot.lane.b32.xlu0 %v227_v24, %s680_s16  ;;  %v228_v25 = vsel %vm221_vm1, %v223_v23, 0.0  ;;  %v224_v26 = vsel %vm221_vm1, %v222_v22, %v223_v23  ;;  %v354_v37 = vstv %s499_s8  ;;  %v272_v46 = vstv %s494_s21  ;;  %s503_s28 = sshll.u32 %s911_s12, 4 }
  0x58   : > { %235 = vrot.lane.b32.xlu1 %v228_v25, %s680_s16  ;;  %v257_v41 = vstv %s836_s9  ;;  %v321_v50 = vstv %s497_s25  ;;  %s195_s4 = scalar_lea.vmem %s890_s2, %s503_s28 }
  0x5b   : > { %233 = vrot.lane.b32.xlu0 %v224_v26, %s680_s16 }
  0xc9   : > { %v232_v27 = vpop.permute.xlu0 %231 }
  0xca   : > { %v241_v30 = vsel %vm240_vm2, 0.0, %v232_v27  ;;  %v236_v32 = vpop.permute.xlu1 %235 }
  0xcb   : > { %v245_v34 = vsel %vm244_vm3, %v241_v30, 0.0  ;;  %v243_v35 = vsel %vm240_vm2, 0.0, %v236_v32 }
  0xcc   : > { %v247_v38 = vsel %vm244_vm3, %v243_v35, 0.0  ;;  %v290_v39 = vmul.f32 %v289_v28, %v245_v34  ;;  %v339_v40 = vmul.f32 %v338_v29, %v245_v34  ;;  %v263_v48 = vmul.f32 %v262_v33, %v245_v34 }
  0xcd   : > { %v292_v42 = vmul.f32 %v289_v28, %v247_v38  ;;  %v308_v43 = vmul.f32 %v305_v31, %v247_v38  ;;  %v234_v44 = vpop.permute.xlu0 %233  ;;  %v341_v45 = vmul.f32 %v338_v29, %v247_v38  ;;  %v268_v49 = vmul.f32 %v267_v36, %v245_v34 }
  0xce   : > { %v242_v47 = vsel %vm240_vm2, 0.0, %v234_v44  ;;  %v296_v52 = vrot.slane %v290_v39, 1  ;;  %v345_v53 = vrot.slane %v339_v40, 2  ;;  %v306_v54 = vmul.f32 %v305_v31, %v245_v34 }
  0xcf   : > { %v246_v51 = vsel %vm244_vm3, %v242_v47, 0.0  ;;  %v299_v55 = vrot.slane %v292_v42, 1  ;;  %v315_v59 = vrot.slane %v308_v43, 1  ;;  %v348_v60 = vrot.slane %v341_v45, 2 }
  0xd0   : > { %v291_v56 = vmul.f32 %v289_v28, %v246_v51  ;;  %v340_v57 = vmul.f32 %v338_v29, %v246_v51  ;;  %v307_v58 = vmul.f32 %v305_v31, %v246_v51  ;;  %v355_v61 = vmul.f32 %v354_v37, %v245_v34 }
  0xd1   : > { %v356_v62 = vmul.f32 %v354_v37, %v246_v51  ;;  %v357_v2 = vmul.f32 %v354_v37, %v247_v38  ;;  %v264_v3 = vmul.f32 %v262_v33, %v246_v51  ;;  %v312_v4 = vrot.slane %v306_v54, 1 }
  0xd2   : > { %v297_v63 = vrot.slane %v291_v56, 1  ;;  %v346_v0 = vrot.slane %v340_v57, 2  ;;  %v313_v1 = vrot.slane %v307_v58, 1  ;;  %v361_v5 = vrot.slane %v355_v61, 2 }
  0xd3   : > { %v269_v6 = vmul.f32 %v267_v36, %v246_v51  ;;  %v362_v9 = vrot.slane %v356_v62, 2  ;;  %v273_v10 = vmul.f32 %v272_v46, %v245_v34  ;;  %v364_v18 = vrot.slane %v357_v2, 2 }
  0xd4   : > { %v298_v7 = vsel %vm279_vm4, %v296_v52, %v297_v63  ;;  %v300_v8 = vsel %vm279_vm4, %v297_v63, %v299_v55  ;;  %v347_v12 = vsel %vm328_vm5, %v345_v53, %v346_v0  ;;  %v314_v14 = vsel %vm279_vm4, %v312_v4, %v313_v1 }
  0xd5   : > { %v303_v11 = vadd.f32 %v298_v7, %v263_v48  ;;  %v304_v13 = vadd.f32 %v300_v8, %v264_v3  ;;  %v349_v15 = vsel %vm328_vm5, %v346_v0, %v348_v60  ;;  %v319_v16 = vadd.f32 %v314_v14, %v268_v49 }
  0xd6   : > { %v316_v17 = vsel %vm279_vm4, %v313_v1, %v315_v59  ;;  %v322_v22 = vmul.f32 %v321_v50, %v245_v34  ;;  %v258_v23 = vmul.f32 %v257_v41, %v245_v34  ;;  %v323_v24 = vmul.f32 %v321_v50, %v246_v51 }
  0xd7   : > { %v352_v19 = vadd.f32 %v347_v12, %v303_v11  ;;  %v353_v20 = vadd.f32 %v349_v15, %v304_v13  ;;  %v320_v21 = vadd.f32 %v316_v17, %v269_v6  ;;  %v274_v25 = vmul.f32 %v272_v46, %v246_v51 }
  0xd8   : > { %v363_v26 = vsel %vm328_vm5, %v361_v5, %v362_v9  ;;  %v280_v27 = vrot.slane %v273_v10, 1  ;;  %v275_v28 = vmul.f32 %v272_v46, %v247_v38  ;;  %v324_v29 = vmul.f32 %v321_v50, %v247_v38 }
  0xd9   : > { %372 = vrot.lane.b32.xlu1 %v352_v19, %s681_s26  ;;  %374 = vrot.lane.b32.xlu0 %v353_v20, %s681_s26  ;;  %v365_v30 = vsel %vm328_vm5, %v362_v9, %v364_v18  ;;  %v329_v31 = vrot.slane %v322_v22, 2  ;;  %v330_v32 = vrot.slane %v323_v24, 2  ;;  %v281_v33 = vrot.slane %v274_v25, 1 }
  0xda   : > { %v368_v35 = vadd.f32 %v363_v26, %v319_v16  ;;  %v369_v36 = vadd.f32 %v365_v30, %v320_v21  ;;  %v283_v34 = vrot.slane %v275_v28, 1  ;;  %v332_v37 = vrot.slane %v324_v29, 2 }
  0xdb   : > { %v331_v39 = vsel %vm328_vm5, %v329_v31, %v330_v32  ;;  %v282_v40 = vsel %vm279_vm4, %v280_v27, %v281_v33  ;;  %v259_v42 = vmul.f32 %v257_v41, %v246_v51 }
  0xdc   : > { %v287_v38 = vadd.f32 %v282_v40, %v258_v23  ;;  %v284_v43 = vsel %vm279_vm4, %v281_v33, %v283_v34  ;;  %v333_v44 = vsel %vm328_vm5, %v330_v32, %v332_v37 }
  0xdd   : > { %382 = vrot.lane.b32.xlu1 %v368_v35, %s682_s23  ;;  %384 = vrot.lane.b32.xlu0 %v369_v36, %s682_s23  ;;  %v288_v45 = vadd.f32 %v284_v43, %v259_v42 }
  0xde   : > { %v336_v46 = vadd.f32 %v331_v39, %v287_v38 }
  0xdf   : > { %v337_v47 = vadd.f32 %v333_v44, %v288_v45 }
 0x14b   : > { %v373_v48 = vpop.permute.xlu1 %372  ;;  %v375_v49 = vpop.permute.xlu0 %374 }
 0x14c   : > { %v378_v50 = vadd.f32 %v373_v48, %v336_v46  ;;  %v379_v52 = vadd.f32 %v375_v49, %v337_v47 }
 0x14f   : > { %v383_v53 = vpop.permute.xlu1 %382  ;;  %v385_v41 = vpop.permute.xlu0 %384 }
 0x150   : > { %v388_v51 = vadd.f32 %v383_v53, %v378_v50  ;;  %v389_v54 = vadd.f32 %v385_v41, %v379_v52 }
 0x152   : > { %390 = vst.msk [vmem:[%s195_s4] sm:$0xff] %vm204_vm0, %v388_v51  ;;  %391 = vst.msk [vmem:[%s195_s4 + $0x8] sm:$0xff] %vm204_vm0, %v389_v54 }
 0x153 PF: > { %s16_s14 = sadd.s32 1, %s674_s14   ;;  %s903_s9 = smov %s658_s10 }
 0x154   : > { %p13_p11 = scmp.ge.s32.totalorder %s16_s14, 4   ;;  %s904_s10 = smov %s662_s11 }
 0x155   : > { %s905_s11 = smov %s811_s7  ;;  %s906_s12 = smov %s670_s13 }
 0x156   : > { %s907_s13 = smov %s909_s27  ;;  %15 = sbr.rel (!%p13_p11) target bundleno = 5 (0x5), region = 73 }
 0x15d   :  { %413 = vsyncpa [#allocation3], 1 }
 0x15e   :  { %415 = vsyncpa [#allocation3 + $0x1], 1 }
 0x15f   :  { %416 = vsyncpa [#allocation4], 1 }
 0x160   :  { %418 = vsyncpa [#allocation4 + $0x1], 1 }

</bundles_post_ra>
